<compile_context>
chip_gen: v7x
topology: tpu7x:2x2x1
jax: 0.10.0
libtpu: 0.0.40
codegen_flags: <defaults>
</compile_context>

<pallas_src>
import functools

import jax
import jax.numpy as jnp
from jax.experimental import pallas as pl
from jax.experimental.pallas import tpu as pltpu


def _resblock_kernel(x_ref, masks_ref, w1_ref, b1_ref, w2_ref, b2_ref, o_ref,
                     *, H, W, C, res_scale):
    """One batch element per grid step.

    x_ref    : (1, C, H*W)  input image, spatial flattened on lanes
    masks_ref: (9, H*W)     per-tap boundary-validity masks (0/1 float)
    w*_ref   : (9, C, C)    conv weights, tap-major, each (C_out, C_in)
    b*_ref   : (C, 1)       conv biases
    o_ref    : (1, C, H*W)  output
    """
    HW = H * W
    xf = x_ref[0].astype(jnp.float32)                    # (C, HW)

    def conv3x3(inp, w_ref, b_ref):
        acc = jnp.zeros((C, HW), jnp.float32)
        for kh in range(3):
            for kw in range(3):
                k = kh * 3 + kw
                s = (kh - 1) * W + (kw - 1)              # flat source offset
                xt = inp
                if s != 0:
                    # out[p] needs in[p + s]  ->  rotate by -s (mod HW); XLU op,
                    # data stays in vregs (no VMEM relayout copies).
                    xt = pltpu.roll(xt, shift=(-s) % HW, axis=1)
                if k != 4:                               # center tap: no mask
                    xt = xt * masks_ref[k:k + 1, :]      # zero out-of-image taps
                acc = acc + jnp.dot(w_ref[k], xt,
                                    preferred_element_type=jnp.float32)
        return acc + b_ref[...]

    mid = jnp.maximum(conv3x3(xf, w1_ref, b1_ref), 0.0)  # conv1 + ReLU (in vregs)
    res = conv3x3(mid, w2_ref, b2_ref)                   # conv2
    o_ref[0] = (xf + res * res_scale).astype(o_ref.dtype)


def residual_block_nobn(x_nchw, w1, b1, w2, b2, res_scale=1.0):
    """Pallas forward of ResidualBlockNoBN.

    x_nchw: (N, C, H, W) float32   (PyTorch convention)
    w1,w2 : (C, C, 3, 3) float32   (PyTorch OIHW)
    b1,b2 : (C,)         float32
    """
    N, C, H, W = x_nchw.shape
    HW = H * W

    # Lane-dense view: (N, C, H*W).  Contiguous reshape, no transpose needed.
    x_flat = x_nchw.reshape(N, C, HW)

    # OIHW -> tap-major (kh*3+kw, C_out, C_in)
    w1_t = jnp.transpose(w1, (2, 3, 0, 1)).reshape(9, C, C)
    w2_t = jnp.transpose(w2, (2, 3, 0, 1)).reshape(9, C, C)
    b1_c = b1.reshape(C, 1)
    b2_c = b2.reshape(C, 1)

    # Per-tap validity masks over flattened (h, w): zero where the shifted
    # source pixel falls outside the image (emulates the conv's zero padding).
    hh = jnp.arange(H)
    ww = jnp.arange(W)
    mask_rows = []
    for kh in range(3):
        for kw in range(3):
            dh, dw = kh - 1, kw - 1
            mh = (hh + dh >= 0) & (hh + dh < H)
            mw = (ww + dw >= 0) & (ww + dw < W)
            mask_rows.append((mh[:, None] & mw[None, :]).reshape(HW))
    masks = jnp.stack(mask_rows).astype(jnp.float32)     # (9, HW)

    kernel = functools.partial(_resblock_kernel, H=H, W=W, C=C,
                               res_scale=float(res_scale))

    flops = int(N) * 2 * (2 * HW * 9 * C * C)            # two 3x3 convs
    bytes_accessed = 4 * int(2 * x_flat.size + masks.size
                             + w1_t.size + w2_t.size + b1_c.size + b2_c.size)

    out_flat = pl.pallas_call(
        kernel,
        out_shape=jax.ShapeDtypeStruct((N, C, HW), x_nchw.dtype),
        grid_spec=pltpu.PrefetchScalarGridSpec(
            num_scalar_prefetch=0,
            grid=(N,),
            in_specs=[
                pl.BlockSpec((1, C, HW), lambda n: (n, 0, 0)),
                pl.BlockSpec((9, HW), lambda n: (0, 0)),
                pl.BlockSpec((9, C, C), lambda n: (0, 0, 0)),
                pl.BlockSpec((C, 1), lambda n: (0, 0)),
                pl.BlockSpec((9, C, C), lambda n: (0, 0, 0)),
                pl.BlockSpec((C, 1), lambda n: (0, 0)),
            ],
            out_specs=pl.BlockSpec((1, C, HW), lambda n: (n, 0, 0)),
        ),
        compiler_params=pltpu.CompilerParams(
            dimension_semantics=("parallel",),
            vmem_limit_bytes=32 * 1024 * 1024),
        cost_estimate=pl.CostEstimate(flops=flops, transcendentals=0,
                                      bytes_accessed=bytes_accessed),
    )(x_flat, masks, w1_t, b1_c, w2_t, b2_c)

    # TODO(synk): for large H*W*C (real EDSR shapes, e.g. C=64, 256x256) add a
    # spatial grid axis with a 1-row halo, feed bf16 activations/weights to the
    # MXU, and fuse the 3 kw taps into K=3C matmuls; the per-image block here
    # is sized for the small test shape.
    return out_flat.reshape(N, C, H, W)


def _ref_forward(x, w1, b1, w2, b2, res_scale):
    """Pure-JAX reference (matches PyTorch Conv2d semantics, NCHW/OIHW)."""
    def conv(v, w, b):
        y = jax.lax.conv_general_dilated(
            v, w, window_strides=(1, 1), padding="SAME",
            dimension_numbers=("NCHW", "OIHW", "NCHW"))
        return y + b[None, :, None, None]

    out = conv(jax.nn.relu(conv(x, w1, b1)), w2, b2)
    return x + out * res_scale


if __name__ == "__main__":
    # Module config (small shapes): mid_channels=4, res_scale=1.0
    N, C, H, W = 2, 4, 16, 16
    res_scale = 1.0

    key = jax.random.PRNGKey(0)
    kx, k1, k2 = jax.random.split(key, 3)

    x = jax.random.normal(kx, (N, C, H, W), dtype=jnp.float32)

    # Kaiming-normal fan_in init (a=0) scaled by 0.1, bias = 0
    # (matches default_init_weights(module, scale=0.1)).
    fan_in = C * 3 * 3
    std = (2.0 / fan_in) ** 0.5
    w1 = jax.random.normal(k1, (C, C, 3, 3), dtype=jnp.float32) * std * 0.1
    w2 = jax.random.normal(k2, (C, C, 3, 3), dtype=jnp.float32) * std * 0.1
    b1 = jnp.zeros((C,), dtype=jnp.float32)
    b2 = jnp.zeros((C,), dtype=jnp.float32)

    out = residual_block_nobn(x, w1, b1, w2, b2, res_scale)
    out = jax.block_until_ready(out)

    ref = _ref_forward(x, w1, b1, w2, b2, res_scale)
    assert out.shape == (N, C, H, W)
    err = float(jnp.max(jnp.abs(out - ref)))
    assert err < 1e-4, f"mismatch vs reference: max abs err {err}"

    print("KERNEL_OK")
</pallas_src>

<mosaic_0001>
module attributes {stable_mosaic.version = 11 : i64} {
  func.func @_resblock_kernel(%arg0: i32, %arg1: memref<1x4x256xf32, #tpu.memory_space<vmem>>, %arg2: memref<9x256xf32, #tpu.memory_space<vmem>>, %arg3: memref<9x4x4xf32, #tpu.memory_space<vmem>>, %arg4: memref<4x1xf32, #tpu.memory_space<vmem>>, %arg5: memref<9x4x4xf32, #tpu.memory_space<vmem>>, %arg6: memref<4x1xf32, #tpu.memory_space<vmem>>, %arg7: memref<1x4x256xf32, #tpu.memory_space<vmem>>) attributes {dimension_semantics = [#tpu.dimension_semantics<parallel>], iteration_bounds = array<i64: 2>, scalar_prefetch = 0 : i64, scratch_operands = 0 : i64, tpu.core_type = #tpu.core_type<tc>, window_params = [{transform_indices = @transform_0, window_bounds = array<i64: 1, 4, 256>}, {pipeline_mode = #tpu.pipeline_mode<synchronous>, transform_indices = @transform_1, window_bounds = array<i64: 9, 256>}, {pipeline_mode = #tpu.pipeline_mode<synchronous>, transform_indices = @transform_2, window_bounds = array<i64: 9, 4, 4>}, {pipeline_mode = #tpu.pipeline_mode<synchronous>, transform_indices = @transform_3, window_bounds = array<i64: 4, 1>}, {pipeline_mode = #tpu.pipeline_mode<synchronous>, transform_indices = @transform_4, window_bounds = array<i64: 9, 4, 4>}, {pipeline_mode = #tpu.pipeline_mode<synchronous>, transform_indices = @transform_5, window_bounds = array<i64: 4, 1>}, {transform_indices = @transform_6, window_bounds = array<i64: 1, 4, 256>}]} {
    %c0 = arith.constant 0 : index
    %c0_0 = arith.constant 0 : index
    %c0_1 = arith.constant 0 : index
    %0 = vector.load %arg1[%c0, %c0_0, %c0_1] : memref<1x4x256xf32, #tpu.memory_space<vmem>>, vector<1x4x256xf32>
    %1 = vector.shape_cast %0 : vector<1x4x256xf32> to vector<4x256xf32>
    %cst = arith.constant 0.000000e+00 : f32
    %2 = vector.broadcast %cst : f32 to vector<4x256xf32>
    %c17_i32 = arith.constant 17 : i32
    %3 = tpu.dynamic_rotate %1 by %c17_i32 dim 1 : vector<4x256xf32>, i32 -> vector<4x256xf32>
    %c0_2 = arith.constant 0 : index
    %c0_3 = arith.constant 0 : index
    %4 = vector.load %arg2[%c0_2, %c0_3] : memref<9x256xf32, #tpu.memory_space<vmem>>, vector<1x256xf32>
    %5 = vector.broadcast %4 : vector<1x256xf32> to vector<4x256xf32>
    %6 = arith.mulf %3, %5 : vector<4x256xf32>
    %c0_4 = arith.constant 0 : index
    %c0_5 = arith.constant 0 : index
    %c0_6 = arith.constant 0 : index
    %7 = vector.load %arg3[%c0_4, %c0_5, %c0_6] : memref<9x4x4xf32, #tpu.memory_space<vmem>>, vector<1x4x4xf32>
    %8 = vector.shape_cast %7 : vector<1x4x4xf32> to vector<4x4xf32>
    %cst_7 = arith.constant dense<0.000000e+00> : vector<4x256xf32>
    %9 = tpu.matmul %8, %6, %cst_7 {dimension_numbers = #tpu.dot_dimension_numbers<[1], [0], [0], [1], [0, 0, 1, 1], [], []>} : vector<4x4xf32>, vector<4x256xf32>, vector<4x256xf32> -> vector<4x256xf32>
    %10 = arith.addf %2, %9 : vector<4x256xf32>
    %c16_i32 = arith.constant 16 : i32
    %11 = tpu.dynamic_rotate %1 by %c16_i32 dim 1 : vector<4x256xf32>, i32 -> vector<4x256xf32>
    %c1 = arith.constant 1 : index
    %c0_8 = arith.constant 0 : index
    %12 = vector.load %arg2[%c1, %c0_8] : memref<9x256xf32, #tpu.memory_space<vmem>>, vector<1x256xf32>
    %13 = vector.broadcast %12 : vector<1x256xf32> to vector<4x256xf32>
    %14 = arith.mulf %11, %13 : vector<4x256xf32>
    %c1_9 = arith.constant 1 : index
    %c0_10 = arith.constant 0 : index
    %c0_11 = arith.constant 0 : index
    %15 = vector.load %arg3[%c1_9, %c0_10, %c0_11] : memref<9x4x4xf32, #tpu.memory_space<vmem>>, vector<1x4x4xf32>
    %16 = vector.shape_cast %15 : vector<1x4x4xf32> to vector<4x4xf32>
    %cst_12 = arith.constant dense<0.000000e+00> : vector<4x256xf32>
    %17 = tpu.matmul %16, %14, %cst_12 {dimension_numbers = #tpu.dot_dimension_numbers<[1], [0], [0], [1], [0, 0, 1, 1], [], []>} : vector<4x4xf32>, vector<4x256xf32>, vector<4x256xf32> -> vector<4x256xf32>
    %18 = arith.addf %10, %17 : vector<4x256xf32>
    %c15_i32 = arith.constant 15 : i32
    %19 = tpu.dynamic_rotate %1 by %c15_i32 dim 1 : vector<4x256xf32>, i32 -> vector<4x256xf32>
    %c2 = arith.constant 2 : index
    %c0_13 = arith.constant 0 : index
    %20 = vector.load %arg2[%c2, %c0_13] : memref<9x256xf32, #tpu.memory_space<vmem>>, vector<1x256xf32>
    %21 = vector.broadcast %20 : vector<1x256xf32> to vector<4x256xf32>
    %22 = arith.mulf %19, %21 : vector<4x256xf32>
    %c2_14 = arith.constant 2 : index
    %c0_15 = arith.constant 0 : index
    %c0_16 = arith.constant 0 : index
    %23 = vector.load %arg3[%c2_14, %c0_15, %c0_16] : memref<9x4x4xf32, #tpu.memory_space<vmem>>, vector<1x4x4xf32>
    %24 = vector.shape_cast %23 : vector<1x4x4xf32> to vector<4x4xf32>
    %cst_17 = arith.constant dense<0.000000e+00> : vector<4x256xf32>
    %25 = tpu.matmul %24, %22, %cst_17 {dimension_numbers = #tpu.dot_dimension_numbers<[1], [0], [0], [1], [0, 0, 1, 1], [], []>} : vector<4x4xf32>, vector<4x256xf32>, vector<4x256xf32> -> vector<4x256xf32>
    %26 = arith.addf %18, %25 : vector<4x256xf32>
    %c1_i32 = arith.constant 1 : i32
    %27 = tpu.dynamic_rotate %1 by %c1_i32 dim 1 : vector<4x256xf32>, i32 -> vector<4x256xf32>
    %c3 = arith.constant 3 : index
    %c0_18 = arith.constant 0 : index
    %28 = vector.load %arg2[%c3, %c0_18] : memref<9x256xf32, #tpu.memory_space<vmem>>, vector<1x256xf32>
    %29 = vector.broadcast %28 : vector<1x256xf32> to vector<4x256xf32>
    %30 = arith.mulf %27, %29 : vector<4x256xf32>
    %c3_19 = arith.constant 3 : index
    %c0_20 = arith.constant 0 : index
    %c0_21 = arith.constant 0 : index
    %31 = vector.load %arg3[%c3_19, %c0_20, %c0_21] : memref<9x4x4xf32, #tpu.memory_space<vmem>>, vector<1x4x4xf32>
    %32 = vector.shape_cast %31 : vector<1x4x4xf32> to vector<4x4xf32>
    %cst_22 = arith.constant dense<0.000000e+00> : vector<4x256xf32>
    %33 = tpu.matmul %32, %30, %cst_22 {dimension_numbers = #tpu.dot_dimension_numbers<[1], [0], [0], [1], [0, 0, 1, 1], [], []>} : vector<4x4xf32>, vector<4x256xf32>, vector<4x256xf32> -> vector<4x256xf32>
    %34 = arith.addf %26, %33 : vector<4x256xf32>
    %c4 = arith.constant 4 : index
    %c0_23 = arith.constant 0 : index
    %c0_24 = arith.constant 0 : index
    %35 = vector.load %arg3[%c4, %c0_23, %c0_24] : memref<9x4x4xf32, #tpu.memory_space<vmem>>, vector<1x4x4xf32>
    %36 = vector.shape_cast %35 : vector<1x4x4xf32> to vector<4x4xf32>
    %cst_25 = arith.constant dense<0.000000e+00> : vector<4x256xf32>
    %37 = tpu.matmul %36, %1, %cst_25 {dimension_numbers = #tpu.dot_dimension_numbers<[1], [0], [0], [1], [0, 0, 1, 1], [], []>} : vector<4x4xf32>, vector<4x256xf32>, vector<4x256xf32> -> vector<4x256xf32>
    %38 = arith.addf %34, %37 : vector<4x256xf32>
    %c255_i32 = arith.constant 255 : i32
    %39 = tpu.dynamic_rotate %1 by %c255_i32 dim 1 : vector<4x256xf32>, i32 -> vector<4x256xf32>
    %c5 = arith.constant 5 : index
    %c0_26 = arith.constant 0 : index
    %40 = vector.load %arg2[%c5, %c0_26] : memref<9x256xf32, #tpu.memory_space<vmem>>, vector<1x256xf32>
    %41 = vector.broadcast %40 : vector<1x256xf32> to vector<4x256xf32>
    %42 = arith.mulf %39, %41 : vector<4x256xf32>
    %c5_27 = arith.constant 5 : index
    %c0_28 = arith.constant 0 : index
    %c0_29 = arith.constant 0 : index
    %43 = vector.load %arg3[%c5_27, %c0_28, %c0_29] : memref<9x4x4xf32, #tpu.memory_space<vmem>>, vector<1x4x4xf32>
    %44 = vector.shape_cast %43 : vector<1x4x4xf32> to vector<4x4xf32>
    %cst_30 = arith.constant dense<0.000000e+00> : vector<4x256xf32>
    %45 = tpu.matmul %44, %42, %cst_30 {dimension_numbers = #tpu.dot_dimension_numbers<[1], [0], [0], [1], [0, 0, 1, 1], [], []>} : vector<4x4xf32>, vector<4x256xf32>, vector<4x256xf32> -> vector<4x256xf32>
    %46 = arith.addf %38, %45 : vector<4x256xf32>
    %c241_i32 = arith.constant 241 : i32
    %47 = tpu.dynamic_rotate %1 by %c241_i32 dim 1 : vector<4x256xf32>, i32 -> vector<4x256xf32>
    %c6 = arith.constant 6 : index
    %c0_31 = arith.constant 0 : index
    %48 = vector.load %arg2[%c6, %c0_31] : memref<9x256xf32, #tpu.memory_space<vmem>>, vector<1x256xf32>
    %49 = vector.broadcast %48 : vector<1x256xf32> to vector<4x256xf32>
    %50 = arith.mulf %47, %49 : vector<4x256xf32>
    %c6_32 = arith.constant 6 : index
    %c0_33 = arith.constant 0 : index
    %c0_34 = arith.constant 0 : index
    %51 = vector.load %arg3[%c6_32, %c0_33, %c0_34] : memref<9x4x4xf32, #tpu.memory_space<vmem>>, vector<1x4x4xf32>
    %52 = vector.shape_cast %51 : vector<1x4x4xf32> to vector<4x4xf32>
    %cst_35 = arith.constant dense<0.000000e+00> : vector<4x256xf32>
    %53 = tpu.matmul %52, %50, %cst_35 {dimension_numbers = #tpu.dot_dimension_numbers<[1], [0], [0], [1], [0, 0, 1, 1], [], []>} : vector<4x4xf32>, vector<4x256xf32>, vector<4x256xf32> -> vector<4x256xf32>
    %54 = arith.addf %46, %53 : vector<4x256xf32>
    %c240_i32 = arith.constant 240 : i32
    %55 = tpu.dynamic_rotate %1 by %c240_i32 dim 1 : vector<4x256xf32>, i32 -> vector<4x256xf32>
    %c7 = arith.constant 7 : index
    %c0_36 = arith.constant 0 : index
    %56 = vector.load %arg2[%c7, %c0_36] : memref<9x256xf32, #tpu.memory_space<vmem>>, vector<1x256xf32>
    %57 = vector.broadcast %56 : vector<1x256xf32> to vector<4x256xf32>
    %58 = arith.mulf %55, %57 : vector<4x256xf32>
    %c7_37 = arith.constant 7 : index
    %c0_38 = arith.constant 0 : index
    %c0_39 = arith.constant 0 : index
    %59 = vector.load %arg3[%c7_37, %c0_38, %c0_39] : memref<9x4x4xf32, #tpu.memory_space<vmem>>, vector<1x4x4xf32>
    %60 = vector.shape_cast %59 : vector<1x4x4xf32> to vector<4x4xf32>
    %cst_40 = arith.constant dense<0.000000e+00> : vector<4x256xf32>
    %61 = tpu.matmul %60, %58, %cst_40 {dimension_numbers = #tpu.dot_dimension_numbers<[1], [0], [0], [1], [0, 0, 1, 1], [], []>} : vector<4x4xf32>, vector<4x256xf32>, vector<4x256xf32> -> vector<4x256xf32>
    %62 = arith.addf %54, %61 : vector<4x256xf32>
    %c239_i32 = arith.constant 239 : i32
    %63 = tpu.dynamic_rotate %1 by %c239_i32 dim 1 : vector<4x256xf32>, i32 -> vector<4x256xf32>
    %c8 = arith.constant 8 : index
    %c0_41 = arith.constant 0 : index
    %64 = vector.load %arg2[%c8, %c0_41] : memref<9x256xf32, #tpu.memory_space<vmem>>, vector<1x256xf32>
    %65 = vector.broadcast %64 : vector<1x256xf32> to vector<4x256xf32>
    %66 = arith.mulf %63, %65 : vector<4x256xf32>
    %c8_42 = arith.constant 8 : index
    %c0_43 = arith.constant 0 : index
    %c0_44 = arith.constant 0 : index
    %67 = vector.load %arg3[%c8_42, %c0_43, %c0_44] : memref<9x4x4xf32, #tpu.memory_space<vmem>>, vector<1x4x4xf32>
    %68 = vector.shape_cast %67 : vector<1x4x4xf32> to vector<4x4xf32>
    %cst_45 = arith.constant dense<0.000000e+00> : vector<4x256xf32>
    %69 = tpu.matmul %68, %66, %cst_45 {dimension_numbers = #tpu.dot_dimension_numbers<[1], [0], [0], [1], [0, 0, 1, 1], [], []>} : vector<4x4xf32>, vector<4x256xf32>, vector<4x256xf32> -> vector<4x256xf32>
    %70 = arith.addf %62, %69 : vector<4x256xf32>
    %c0_46 = arith.constant 0 : index
    %c0_47 = arith.constant 0 : index
    %71 = vector.load %arg4[%c0_46, %c0_47] : memref<4x1xf32, #tpu.memory_space<vmem>>, vector<4x1xf32>
    %72 = vector.broadcast %71 : vector<4x1xf32> to vector<4x256xf32>
    %73 = arith.addf %70, %72 : vector<4x256xf32>
    %cst_48 = arith.constant 0.000000e+00 : f32
    %74 = vector.broadcast %cst_48 : f32 to vector<4x256xf32>
    %75 = arith.maximumf %73, %74 : vector<4x256xf32>
    %cst_49 = arith.constant 0.000000e+00 : f32
    %76 = vector.broadcast %cst_49 : f32 to vector<4x256xf32>
    %c17_i32_50 = arith.constant 17 : i32
    %77 = tpu.dynamic_rotate %75 by %c17_i32_50 dim 1 : vector<4x256xf32>, i32 -> vector<4x256xf32>
    %c0_51 = arith.constant 0 : index
    %c0_52 = arith.constant 0 : index
    %78 = vector.load %arg2[%c0_51, %c0_52] : memref<9x256xf32, #tpu.memory_space<vmem>>, vector<1x256xf32>
    %79 = vector.broadcast %78 : vector<1x256xf32> to vector<4x256xf32>
    %80 = arith.mulf %77, %79 : vector<4x256xf32>
    %c0_53 = arith.constant 0 : index
    %c0_54 = arith.constant 0 : index
    %c0_55 = arith.constant 0 : index
    %81 = vector.load %arg5[%c0_53, %c0_54, %c0_55] : memref<9x4x4xf32, #tpu.memory_space<vmem>>, vector<1x4x4xf32>
    %82 = vector.shape_cast %81 : vector<1x4x4xf32> to vector<4x4xf32>
    %cst_56 = arith.constant dense<0.000000e+00> : vector<4x256xf32>
    %83 = tpu.matmul %82, %80, %cst_56 {dimension_numbers = #tpu.dot_dimension_numbers<[1], [0], [0], [1], [0, 0, 1, 1], [], []>} : vector<4x4xf32>, vector<4x256xf32>, vector<4x256xf32> -> vector<4x256xf32>
    %84 = arith.addf %76, %83 : vector<4x256xf32>
    %c16_i32_57 = arith.constant 16 : i32
    %85 = tpu.dynamic_rotate %75 by %c16_i32_57 dim 1 : vector<4x256xf32>, i32 -> vector<4x256xf32>
    %c1_58 = arith.constant 1 : index
    %c0_59 = arith.constant 0 : index
    %86 = vector.load %arg2[%c1_58, %c0_59] : memref<9x256xf32, #tpu.memory_space<vmem>>, vector<1x256xf32>
    %87 = vector.broadcast %86 : vector<1x256xf32> to vector<4x256xf32>
    %88 = arith.mulf %85, %87 : vector<4x256xf32>
    %c1_60 = arith.constant 1 : index
    %c0_61 = arith.constant 0 : index
    %c0_62 = arith.constant 0 : index
    %89 = vector.load %arg5[%c1_60, %c0_61, %c0_62] : memref<9x4x4xf32, #tpu.memory_space<vmem>>, vector<1x4x4xf32>
    %90 = vector.shape_cast %89 : vector<1x4x4xf32> to vector<4x4xf32>
    %cst_63 = arith.constant dense<0.000000e+00> : vector<4x256xf32>
    %91 = tpu.matmul %90, %88, %cst_63 {dimension_numbers = #tpu.dot_dimension_numbers<[1], [0], [0], [1], [0, 0, 1, 1], [], []>} : vector<4x4xf32>, vector<4x256xf32>, vector<4x256xf32> -> vector<4x256xf32>
    %92 = arith.addf %84, %91 : vector<4x256xf32>
    %c15_i32_64 = arith.constant 15 : i32
    %93 = tpu.dynamic_rotate %75 by %c15_i32_64 dim 1 : vector<4x256xf32>, i32 -> vector<4x256xf32>
    %c2_65 = arith.constant 2 : index
    %c0_66 = arith.constant 0 : index
    %94 = vector.load %arg2[%c2_65, %c0_66] : memref<9x256xf32, #tpu.memory_space<vmem>>, vector<1x256xf32>
    %95 = vector.broadcast %94 : vector<1x256xf32> to vector<4x256xf32>
    %96 = arith.mulf %93, %95 : vector<4x256xf32>
    %c2_67 = arith.constant 2 : index
    %c0_68 = arith.constant 0 : index
    %c0_69 = arith.constant 0 : index
    %97 = vector.load %arg5[%c2_67, %c0_68, %c0_69] : memref<9x4x4xf32, #tpu.memory_space<vmem>>, vector<1x4x4xf32>
    %98 = vector.shape_cast %97 : vector<1x4x4xf32> to vector<4x4xf32>
    %cst_70 = arith.constant dense<0.000000e+00> : vector<4x256xf32>
    %99 = tpu.matmul %98, %96, %cst_70 {dimension_numbers = #tpu.dot_dimension_numbers<[1], [0], [0], [1], [0, 0, 1, 1], [], []>} : vector<4x4xf32>, vector<4x256xf32>, vector<4x256xf32> -> vector<4x256xf32>
    %100 = arith.addf %92, %99 : vector<4x256xf32>
    %c1_i32_71 = arith.constant 1 : i32
    %101 = tpu.dynamic_rotate %75 by %c1_i32_71 dim 1 : vector<4x256xf32>, i32 -> vector<4x256xf32>
    %c3_72 = arith.constant 3 : index
    %c0_73 = arith.constant 0 : index
    %102 = vector.load %arg2[%c3_72, %c0_73] : memref<9x256xf32, #tpu.memory_space<vmem>>, vector<1x256xf32>
    %103 = vector.broadcast %102 : vector<1x256xf32> to vector<4x256xf32>
    %104 = arith.mulf %101, %103 : vector<4x256xf32>
    %c3_74 = arith.constant 3 : index
    %c0_75 = arith.constant 0 : index
    %c0_76 = arith.constant 0 : index
    %105 = vector.load %arg5[%c3_74, %c0_75, %c0_76] : memref<9x4x4xf32, #tpu.memory_space<vmem>>, vector<1x4x4xf32>
    %106 = vector.shape_cast %105 : vector<1x4x4xf32> to vector<4x4xf32>
    %cst_77 = arith.constant dense<0.000000e+00> : vector<4x256xf32>
    %107 = tpu.matmul %106, %104, %cst_77 {dimension_numbers = #tpu.dot_dimension_numbers<[1], [0], [0], [1], [0, 0, 1, 1], [], []>} : vector<4x4xf32>, vector<4x256xf32>, vector<4x256xf32> -> vector<4x256xf32>
    %108 = arith.addf %100, %107 : vector<4x256xf32>
    %c4_78 = arith.constant 4 : index
    %c0_79 = arith.constant 0 : index
    %c0_80 = arith.constant 0 : index
    %109 = vector.load %arg5[%c4_78, %c0_79, %c0_80] : memref<9x4x4xf32, #tpu.memory_space<vmem>>, vector<1x4x4xf32>
    %110 = vector.shape_cast %109 : vector<1x4x4xf32> to vector<4x4xf32>
    %cst_81 = arith.constant dense<0.000000e+00> : vector<4x256xf32>
    %111 = tpu.matmul %110, %75, %cst_81 {dimension_numbers = #tpu.dot_dimension_numbers<[1], [0], [0], [1], [0, 0, 1, 1], [], []>} : vector<4x4xf32>, vector<4x256xf32>, vector<4x256xf32> -> vector<4x256xf32>
    %112 = arith.addf %108, %111 : vector<4x256xf32>
    %c255_i32_82 = arith.constant 255 : i32
    %113 = tpu.dynamic_rotate %75 by %c255_i32_82 dim 1 : vector<4x256xf32>, i32 -> vector<4x256xf32>
    %c5_83 = arith.constant 5 : index
    %c0_84 = arith.constant 0 : index
    %114 = vector.load %arg2[%c5_83, %c0_84] : memref<9x256xf32, #tpu.memory_space<vmem>>, vector<1x256xf32>
    %115 = vector.broadcast %114 : vector<1x256xf32> to vector<4x256xf32>
    %116 = arith.mulf %113, %115 : vector<4x256xf32>
    %c5_85 = arith.constant 5 : index
    %c0_86 = arith.constant 0 : index
    %c0_87 = arith.constant 0 : index
    %117 = vector.load %arg5[%c5_85, %c0_86, %c0_87] : memref<9x4x4xf32, #tpu.memory_space<vmem>>, vector<1x4x4xf32>
    %118 = vector.shape_cast %117 : vector<1x4x4xf32> to vector<4x4xf32>
    %cst_88 = arith.constant dense<0.000000e+00> : vector<4x256xf32>
    %119 = tpu.matmul %118, %116, %cst_88 {dimension_numbers = #tpu.dot_dimension_numbers<[1], [0], [0], [1], [0, 0, 1, 1], [], []>} : vector<4x4xf32>, vector<4x256xf32>, vector<4x256xf32> -> vector<4x256xf32>
    %120 = arith.addf %112, %119 : vector<4x256xf32>
    %c241_i32_89 = arith.constant 241 : i32
    %121 = tpu.dynamic_rotate %75 by %c241_i32_89 dim 1 : vector<4x256xf32>, i32 -> vector<4x256xf32>
    %c6_90 = arith.constant 6 : index
    %c0_91 = arith.constant 0 : index
    %122 = vector.load %arg2[%c6_90, %c0_91] : memref<9x256xf32, #tpu.memory_space<vmem>>, vector<1x256xf32>
    %123 = vector.broadcast %122 : vector<1x256xf32> to vector<4x256xf32>
    %124 = arith.mulf %121, %123 : vector<4x256xf32>
    %c6_92 = arith.constant 6 : index
    %c0_93 = arith.constant 0 : index
    %c0_94 = arith.constant 0 : index
    %125 = vector.load %arg5[%c6_92, %c0_93, %c0_94] : memref<9x4x4xf32, #tpu.memory_space<vmem>>, vector<1x4x4xf32>
    %126 = vector.shape_cast %125 : vector<1x4x4xf32> to vector<4x4xf32>
    %cst_95 = arith.constant dense<0.000000e+00> : vector<4x256xf32>
    %127 = tpu.matmul %126, %124, %cst_95 {dimension_numbers = #tpu.dot_dimension_numbers<[1], [0], [0], [1], [0, 0, 1, 1], [], []>} : vector<4x4xf32>, vector<4x256xf32>, vector<4x256xf32> -> vector<4x256xf32>
    %128 = arith.addf %120, %127 : vector<4x256xf32>
    %c240_i32_96 = arith.constant 240 : i32
    %129 = tpu.dynamic_rotate %75 by %c240_i32_96 dim 1 : vector<4x256xf32>, i32 -> vector<4x256xf32>
    %c7_97 = arith.constant 7 : index
    %c0_98 = arith.constant 0 : index
    %130 = vector.load %arg2[%c7_97, %c0_98] : memref<9x256xf32, #tpu.memory_space<vmem>>, vector<1x256xf32>
    %131 = vector.broadcast %130 : vector<1x256xf32> to vector<4x256xf32>
    %132 = arith.mulf %129, %131 : vector<4x256xf32>
    %c7_99 = arith.constant 7 : index
    %c0_100 = arith.constant 0 : index
    %c0_101 = arith.constant 0 : index
    %133 = vector.load %arg5[%c7_99, %c0_100, %c0_101] : memref<9x4x4xf32, #tpu.memory_space<vmem>>, vector<1x4x4xf32>
    %134 = vector.shape_cast %133 : vector<1x4x4xf32> to vector<4x4xf32>
    %cst_102 = arith.constant dense<0.000000e+00> : vector<4x256xf32>
    %135 = tpu.matmul %134, %132, %cst_102 {dimension_numbers = #tpu.dot_dimension_numbers<[1], [0], [0], [1], [0, 0, 1, 1], [], []>} : vector<4x4xf32>, vector<4x256xf32>, vector<4x256xf32> -> vector<4x256xf32>
    %136 = arith.addf %128, %135 : vector<4x256xf32>
    %c239_i32_103 = arith.constant 239 : i32
    %137 = tpu.dynamic_rotate %75 by %c239_i32_103 dim 1 : vector<4x256xf32>, i32 -> vector<4x256xf32>
    %c8_104 = arith.constant 8 : index
    %c0_105 = arith.constant 0 : index
    %138 = vector.load %arg2[%c8_104, %c0_105] : memref<9x256xf32, #tpu.memory_space<vmem>>, vector<1x256xf32>
    %139 = vector.broadcast %138 : vector<1x256xf32> to vector<4x256xf32>
    %140 = arith.mulf %137, %139 : vector<4x256xf32>
    %c8_106 = arith.constant 8 : index
    %c0_107 = arith.constant 0 : index
    %c0_108 = arith.constant 0 : index
    %141 = vector.load %arg5[%c8_106, %c0_107, %c0_108] : memref<9x4x4xf32, #tpu.memory_space<vmem>>, vector<1x4x4xf32>
    %142 = vector.shape_cast %141 : vector<1x4x4xf32> to vector<4x4xf32>
    %cst_109 = arith.constant dense<0.000000e+00> : vector<4x256xf32>
    %143 = tpu.matmul %142, %140, %cst_109 {dimension_numbers = #tpu.dot_dimension_numbers<[1], [0], [0], [1], [0, 0, 1, 1], [], []>} : vector<4x4xf32>, vector<4x256xf32>, vector<4x256xf32> -> vector<4x256xf32>
    %144 = arith.addf %136, %143 : vector<4x256xf32>
    %c0_110 = arith.constant 0 : index
    %c0_111 = arith.constant 0 : index
    %145 = vector.load %arg6[%c0_110, %c0_111] : memref<4x1xf32, #tpu.memory_space<vmem>>, vector<4x1xf32>
    %146 = vector.broadcast %145 : vector<4x1xf32> to vector<4x256xf32>
    %147 = arith.addf %144, %146 : vector<4x256xf32>
    %cst_112 = arith.constant 1.000000e+00 : f32
    %148 = vector.broadcast %cst_112 : f32 to vector<4x256xf32>
    %149 = arith.mulf %147, %148 : vector<4x256xf32>
    %150 = arith.addf %1, %149 : vector<4x256xf32>
    %c0_113 = arith.constant 0 : index
    %c0_114 = arith.constant 0 : index
    %c0_115 = arith.constant 0 : index
    %151 = vector.load %arg7[%c0_113, %c0_114, %c0_115] : memref<1x4x256xf32, #tpu.memory_space<vmem>>, vector<1x4x256xf32>
    %152 = vector.shape_cast %151 : vector<1x4x256xf32> to vector<4x256xf32>
    %153 = vector.shape_cast %150 : vector<4x256xf32> to vector<1x4x256xf32>
    tpu.vector_store %arg7[%c0_113, %c0_114, %c0_115], %153 {strides = array<i32>} : memref<1x4x256xf32, #tpu.memory_space<vmem>>, vector<1x4x256xf32>,
    return
  }
  func.func @transform_0(%arg0: i32) -> (i32, i32, i32) {
    %c0_i32 = arith.constant 0 : i32
    %c0_i32_0 = arith.constant 0 : i32
    %c0_i32_1 = arith.constant 0 : i32
    return %arg0, %c0_i32, %c0_i32_0 : i32, i32, i32
  }
  func.func @transform_1(%arg0: i32) -> (i32, i32) {
    %c0_i32 = arith.constant 0 : i32
    %c0_i32_0 = arith.constant 0 : i32
    %c0_i32_1 = arith.constant 0 : i32
    return %c0_i32, %c0_i32_0 : i32, i32
  }
  func.func @transform_2(%arg0: i32) -> (i32, i32, i32) {
    %c0_i32 = arith.constant 0 : i32
    %c0_i32_0 = arith.constant 0 : i32
    %c0_i32_1 = arith.constant 0 : i32
    %c0_i32_2 = arith.constant 0 : i32
    return %c0_i32, %c0_i32_0, %c0_i32_1 : i32, i32, i32
  }
  func.func @transform_3(%arg0: i32) -> (i32, i32) {
    %c0_i32 = arith.constant 0 : i32
    %c0_i32_0 = arith.constant 0 : i32
    %c0_i32_1 = arith.constant 0 : i32
    return %c0_i32, %c0_i32_0 : i32, i32
  }
  func.func @transform_4(%arg0: i32) -> (i32, i32, i32) {
    %c0_i32 = arith.constant 0 : i32
    %c0_i32_0 = arith.constant 0 : i32
    %c0_i32_1 = arith.constant 0 : i32
    %c0_i32_2 = arith.constant 0 : i32
    return %c0_i32, %c0_i32_0, %c0_i32_1 : i32, i32, i32
  }
  func.func @transform_5(%arg0: i32) -> (i32, i32) {
    %c0_i32 = arith.constant 0 : i32
    %c0_i32_0 = arith.constant 0 : i32
    %c0_i32_1 = arith.constant 0 : i32
    return %c0_i32, %c0_i32_0 : i32, i32
  }
  func.func @transform_6(%arg0: i32) -> (i32, i32, i32) {
    %c0_i32 = arith.constant 0 : i32
    %c0_i32_0 = arith.constant 0 : i32
    %c0_i32_1 = arith.constant 0 : i32
    return %arg0, %c0_i32, %c0_i32_0 : i32, i32, i32
  }
}

</mosaic_0001>

<bundles_post_ra>
// kernel: tpu_custom_call.1
= control target key start
LH: loop header
LB: loop body
LE: loop exit
PB: predicated region body
PF: predicated region fallthrough
CT: control target
= control target key end

     0   :  { %11 = vsyncpa [#allocation3], 0  ;;  %s2861_s0 = inlined_call_operand.vmem [shape: f32[2,4,256], index: 0, kind: input, shape index: {}]   ;;  %s2862_s1 = inlined_call_operand.vmem [shape: f32[9,256], index: 1, kind: input, shape index: {}]   ;;  %s2863_s2 = inlined_call_operand.vmem [shape: f32[9,4,4], index: 2, kind: input, shape index: {}]   ;;  %s2864_s3 = inlined_call_operand.vmem [shape: f32[4,1], index: 3, kind: input, shape index: {}]   ;;  %s2865_s4 = inlined_call_operand.vmem [shape: f32[9,4,4], index: 4, kind: input, shape index: {}]   ;;  %s2866_s5 = inlined_call_operand.vmem [shape: f32[4,1], index: 5, kind: input, shape index: {}]   ;;  %s2867_s6 = inlined_call_operand.hbm [shape: f32[2,4,256], index: 6, kind: output, shape index: {}]  }
   0x1   :  { %13 = vsyncpa [#allocation3 + $0x1], 0  ;;  %s2379_s21 = smov 0   ;;  %s2381_s22 = smov 0  }
   0x2   :  { %s2383_s23 = smov 0   ;;  %s2385_s24 = smov 0  }
   0x3 LB: > { %s2400_s25 = sadd.s32 4294967295, %s2331_s24   ;;  %s2095_s26 = sadd.s32 4294967294, %s2331_s24   ;;  %s2331_s24 = sphi %s2385_s24, %s2873_s24   ;;  %s2327_s23 = sphi %s2383_s23, %s2872_s23   ;;  %s2323_s22 = sphi %s2381_s22, %s2871_s22   ;;  %s2319_s21 = sphi %s2379_s21, %s2870_s21  }
   0x4   : > { %s2404_s27 = sadd.s32 1, %s2331_s24   ;;  %s157_s28 = sadd.s32 1, %s2327_s23 }
   0x5   : > { %s154_s29 = ssub.s32 %s2331_s24, %s2404_s27  ;;  %p167_p0 = scmp.ne.s32.totalorder %s2327_s23, %s2323_s22 }
   0x6   : > { %p155_p1 = scmp.eq.s32.totalorder %s154_s29, 0  ;;  %p168_p2 = scmp.eq.s32.totalorder %s2400_s25, 1 }
   0x7   : > { %p173_p3 = scmp.ne.s32.totalorder %s2323_s22, %s2319_s21  ;;  %p174_p4 = scmp.eq.s32.totalorder %s2095_s26, 1 }
   0x8   : > { %s2415_s30 = scalar_select %p155_p1, %s2327_s23, %s157_s28  }
   0x9   : > { %p2417_p5 = por %p168_p2, %p167_p0  ;;  %p2421_p6 = por %p174_p4, %p173_p3 }
   0xa   : > { %p2098_p7 = scmp.ge.s32.totalorder %s2331_s24, 1  ;;  %p215_p8 = scmp.lt.s32.totalorder %s2331_s24, 3 }
   0xc   : > { %p216_p9 = pnand %p2098_p7, %p215_p8 }
   0xd   : > { %p245_p10 = scmp.lt.s32.totalorder (!%p216_p9), %s2400_s25, 1  ;;  %v2333_v0 = vmov (!%p216_p9), 0.0   ;;  %s2334_s14 = smov (!%p216_p9), 17   ;;  %v1182_v3 = vld [vmem:[%s2864_s3] sm:$0xf] (!%p216_p9)  ;;  %v2342_v4 = vmov (!%p216_p9), 0   ;;  %v258_v5 = vlaneseq (!%p216_p9) }
   0xe   : > { %219 = sbr.rel (%p216_p9) target bundleno = 851 (0x353), region = 44  ;;  %377 = vmatprep.mubr.f32.mxu0 (!%p216_p9), %v2333_v0  ;;  %1284 = vmatprep.mubr.f32.mxu1 (!%p216_p9), %v2333_v0  ;;  %s2335_s15 = smov (!%p216_p9), 16   ;;  %v263_v10 = vld [vmem:[%s2862_s1] ss:$8 sm:$0x3] (!%p216_p9)  ;;  %vm306_vm2 = vcmask (!%p216_p9), 1043456  }
   0xf   : > { %s2336_s16 = smov (!%p216_p9), 15   ;;  %s2337_s17 = smov (!%p216_p9), 1   ;;  %2267 = vset.pattern.permute.xlu0 (!%p216_p9), %v2342_v4  ;;  %v266_v6 = vshrl.u32 (!%p216_p9), %v258_v5, 7  ;;  %v2475_v7 = vand.u32 (!%p216_p9), 127, %v258_v5  ;;  %v2103_v30 = vld [vmem:[%s2863_s2 + $0x4] sm:$0xf] (!%p216_p9) }
  0x10   : > { %s2338_s18 = smov (!%p216_p9), 127   ;;  %s2339_s19 = smov (!%p216_p9), 113   ;;  %v2102_v11 = vld [vmem:[%s2862_s1 + $0x1] ss:$8 sm:$0x3] (!%p216_p9)  ;;  %vm302_vm4 = vcmask (!%p216_p9), 31744  }
  0x11   : > { %s2340_s20 = smov (!%p216_p9), 112   ;;  %s2341_s26 = smov (!%p216_p9), 111   ;;  %v2477_v8 = vsub.s32 (!%p216_p9), 0, %v266_v6  ;;  %v2479_v9 = vsub.s32 (!%p216_p9), 1, %v266_v6  ;;  %vm260_vm0 = vcmp.lt.s32.totalorder (!%p216_p9), %v2475_v7, 17  ;;  %vm282_vm1 = vcmp.lt.s32.totalorder (!%p216_p9), %v2475_v7, 16 }
  0x12   : > { %v2110_v18 = vld [vmem:[%s2862_s1 + $0x2] ss:$8 sm:$0x3] (!%p216_p9)  ;;  %vm468_vm3 = vcmp.lt.s32.totalorder (!%p216_p9), %v2475_v7, 15  ;;  %vm574_vm5 = vcmp.lt.s32.totalorder (!%p216_p9), %v2475_v7, 1  ;;  %vm762_vm6 = vcmp.lt.s32.totalorder (!%p216_p9), %v2475_v7, 127 }
  0x13   : > { %v2489_v14 = vrot.slane (!%p216_p9), %v263_v10, %v2479_v9  ;;  %v2493_v15 = vrot.slane (!%p216_p9), %v2102_v11, %v2477_v8  ;;  %v2496_v16 = vrot.slane (!%p216_p9), %v2102_v11, %v2479_v9  ;;  %v2499_v17 = vrot.slane (!%p216_p9), %v263_v10, %v2477_v8  ;;  %v2115_v34 = vld [vmem:[%s2862_s1 + $0x3] ss:$8 sm:$0x3] (!%p216_p9)  ;;  %v2124_v49 = vld [vmem:[%s2862_s1 + $0x5] ss:$8 sm:$0x3] (!%p216_p9) }
  0x14   : > { %v2517_v28 = vrot.slane (!%p216_p9), %v2110_v18, %v2479_v9  ;;  %v2536_v36 = vrot.slane (!%p216_p9), %v2110_v18, %v2477_v8  ;;  %v2543_v39 = vrot.slane (!%p216_p9), %v2115_v34, %v2479_v9  ;;  %v277_v43 = vld [vmem:[%s2863_s2] sm:$0xf] (!%p216_p9)  ;;  %v2555_v45 = vrot.slane (!%p216_p9), %v2115_v34, %v2477_v8  ;;  %v2111_v48 = vld [vmem:[%s2863_s2 + $0x8] sm:$0xf] (!%p216_p9)  ;;  %v2116_v54 = vld [vmem:[%s2863_s2 + $0xc] sm:$0xf] (!%p216_p9) }
  0x15   : > { %s246_s9 = scalar_select %p245_p10, %s2400_s25, 1  ;;  %v2575_v52 = vrot.slane %v2124_v49, %v2479_v9  ;;  %v2129_v56 = vld [vmem:[%s2862_s1 + $0x6] ss:$8 sm:$0x3]  ;;  %vm868_vm7 = vcmp.lt.s32.totalorder %v2475_v7, 113  ;;  %v2591_v59 = vrot.slane %v2124_v49, %v2477_v8  ;;  %vm974_vm8 = vcmp.lt.s32.totalorder %v2475_v7, 112 }
  0x16   : > { %v2598_v61 = vrot.slane %v2129_v56, %v2479_v9  ;;  %v2134_v4 = vld [vmem:[%s2862_s1 + $0x7] ss:$8 sm:$0x3]  ;;  %v2614_v10 = vrot.slane %v2129_v56, %v2477_v8  ;;  %vm1080_vm9 = vcmp.lt.s32.totalorder %v2475_v7, 111  ;;  %v2135_v34 = vld [vmem:[%s2863_s2 + $0x1c] sm:$0xf] }
  0x17   : > { %s2184_s10 = sshll.u32 %s246_s9, 3 }
  0x18   : > { %s249_s13 = scalar_lea.vmem %s2861_s0, %s2184_s10 }
  0x19   : > { %v2434_v1 = vld [vmem:[%s249_s13] sm:$0xff] }
  0x1a   : > { %254 = vrot.lane.b32.xlu1 %v2434_v1, %s2334_s14  ;;  %278 = vrot.lane.b32.xlu0 %v2434_v1, %s2335_s15  ;;  %v2442_v2 = vcombine.high %v2434_v1, %v2434_v1 }
  0x1e   : > { %256 = vrot.lane.b32.xlu1 %v2442_v2, %s2334_s14  ;;  %280 = vrot.lane.b32.xlu0 %v2442_v2, %s2335_s15 }
  0x22   : > { %466 = vrot.lane.b32.xlu1 %v2442_v2, %s2336_s16  ;;  %464 = vrot.lane.b32.xlu0 %v2434_v1, %s2336_s16 }
  0x26   : > { %572 = vrot.lane.b32.xlu1 %v2442_v2, %s2337_s17  ;;  %570 = vrot.lane.b32.xlu0 %v2434_v1, %s2337_s17 }
  0x2a   : > { %760 = vrot.lane.b32.xlu1 %v2442_v2, %s2338_s18  ;;  %758 = vrot.lane.b32.xlu0 %v2434_v1, %s2338_s18 }
  0x2e   : > { %866 = vrot.lane.b32.xlu1 %v2442_v2, %s2339_s19  ;;  %864 = vrot.lane.b32.xlu0 %v2434_v1, %s2339_s19 }
  0x32   : > { %972 = vrot.lane.b32.xlu1 %v2442_v2, %s2340_s20  ;;  %970 = vrot.lane.b32.xlu0 %v2434_v1, %s2340_s20 }
  0x36   : > { %1078 = vrot.lane.b32.xlu1 %v2442_v2, %s2341_s26  ;;  %1076 = vrot.lane.b32.xlu0 %v2434_v1, %s2341_s26 }
  0x3a   : > { %1185 = vperm.xlu0 %2267, %v1182_v3  }
  0x8c   : > { %v255_v12 = vpop.permute.xlu1 %254  ;;  %v279_v13 = vpop.permute.xlu0 %278 }
  0x90   : > { %v257_v19 = vpop.permute.xlu1 %256  ;;  %v281_v20 = vpop.permute.xlu0 %280 }
  0x91   : > { %v261_v21 = vsel %vm260_vm0, %v255_v12, %v257_v19  ;;  %v262_v22 = vsel %vm260_vm0, %v257_v19, %v255_v12  ;;  %v283_v23 = vsel %vm282_vm1, %v279_v13, %v281_v20  ;;  %v284_v24 = vsel %vm282_vm1, %v281_v20, %v279_v13  ;;  %v2125_v19 = vld [vmem:[%s2863_s2 + $0x14] sm:$0xf] }
  0x92   : > { %v276_v25 = vmul.f32 %v2489_v14, %v261_v21  ;;  %v298_v26 = vmul.f32 %v2493_v15, %v284_v24  ;;  %v299_v27 = vmul.f32 %v2496_v16, %v283_v23  ;;  %v275_v29 = vmul.f32 %v2499_v17, %v262_v22  ;;  %v2139_v21 = vld [vmem:[%s2862_s1 + $0x10] ss:$8 sm:$0x3] }
  0x93   : > { %v2621_v12 = vrot.slane %v2134_v4, %v2479_v9  ;;  %v2637_v24 = vrot.slane %v2134_v4, %v2477_v8 }
  0x94   : > { %2104 = vmatprep.subr.msk.mxu0 %vm306_vm2, %v299_v27  ;;  %v467_v31 = vpop.permute.xlu1 %466  ;;  %v465_v32 = vpop.permute.xlu0 %464 }
  0x95   : > { %2105 = vmatpush1.msk.msra.mxu0 %vm306_vm2, %v298_v26  ;;  %v469_v33 = vsel %vm468_vm3, %v465_v32, %v467_v31  ;;  %v470_v37 = vsel %vm468_vm3, %v467_v31, %v465_v32  ;;  %v2644_v26 = vrot.slane %v2139_v21, %v2479_v9  ;;  %v2656_v32 = vrot.slane %v2139_v21, %v2477_v8  ;;  %v2140_v8 = vld [vmem:[%s2863_s2 + $0x20] sm:$0xf] }
  0x96   : > { %2106 = vmatmul.mubr.msk.f32.vlgmr.msra.gmra.mrb[0].mxu0 %vm302_vm4, %v2103_v30  ;;  %2107 = vmatprep.subr.msk.mxu0 %vm306_vm2, %v276_v25  ;;  %v485_v35 = vmul.f32 %v2517_v28, %v469_v33  ;;  %v484_v42 = vmul.f32 %v2536_v36, %v470_v37  ;;  %v2130_v30 = vld [vmem:[%s2863_s2 + $0x18] sm:$0xf] }
  0x97   : > { %2108 = vmatpush1.msk.msra.mxu0 %vm306_vm2, %v275_v29  ;;  %457 = vmatprep.mubr.f32.mxu0 %v2333_v0 }
  0x98   : > { %2112 = vmatprep.subr.msk.mxu0 %vm306_vm2, %v485_v35  ;;  %v573_v38 = vpop.permute.xlu1 %572  ;;  %v571_v40 = vpop.permute.xlu0 %570 }
  0x99   : > { %v575_v41 = vsel %vm574_vm5, %v571_v40, %v573_v38  ;;  %v576_v46 = vsel %vm574_vm5, %v573_v38, %v571_v40 }
  0x9a   : > { %v591_v44 = vmul.f32 %v2543_v39, %v575_v41  ;;  %v590_v47 = vmul.f32 %v2555_v45, %v576_v46 }
  0x9c   : > { %v761_v50 = vpop.permute.xlu1 %760  ;;  %v759_v51 = vpop.permute.xlu0 %758 }
  0x9d   : > { %v764_v53 = vsel %vm762_vm6, %v761_v50, %v759_v51  ;;  %v763_v60 = vsel %vm762_vm6, %v759_v51, %v761_v50 }
  0x9e   : > { %2109 = vmatmul.mubr.msk.f32.vlgmr.msra.gmra.mrb[0].mxu0 %vm302_vm4, %v277_v43  ;;  %v779_v55 = vmul.f32 %v2575_v52, %v764_v53  ;;  %v778_v63 = vmul.f32 %v2591_v59, %v763_v60 }
  0x9f   : > { %2113 = vmatpush1.msk.msra.mxu0 %vm306_vm2, %v484_v42  ;;  %561 = vmatprep.mubr.f32.mxu0 %v2333_v0 }
  0xa0   : > { %2117 = vmatprep.subr.msk.mxu0 %vm306_vm2, %v591_v44  ;;  %v867_v57 = vpop.permute.xlu1 %866  ;;  %v865_v58 = vpop.permute.xlu0 %864  ;;  %v2007_v44 = vld [vmem:[%s2866_s5] sm:$0xf] }
  0xa1   : > { %v870_v62 = vsel %vm868_vm7, %v867_v57, %v865_v58  ;;  %v869_v11 = vsel %vm868_vm7, %v865_v58, %v867_v57 }
  0xa2   : > { %v885_v3 = vmul.f32 %v2598_v61, %v870_v62  ;;  %v884_v18 = vmul.f32 %v2614_v10, %v869_v11 }
  0xa4   : > { %v973_v5 = vpop.permute.xlu1 %972  ;;  %v971_v6 = vpop.permute.xlu0 %970 }
  0xa5   : > { %v976_v13 = vsel %vm974_vm8, %v973_v5, %v971_v6  ;;  %v975_v25 = vsel %vm974_vm8, %v971_v6, %v973_v5 }
  0xa6   : > { %2114 = vmatmul.mubr.msk.f32.vlgmr.msra.gmra.mrb[0].mxu0 %vm302_vm4, %v2111_v48  ;;  %v991_v20 = vmul.f32 %v2621_v12, %v976_v13  ;;  %v990_v29 = vmul.f32 %v2637_v24, %v975_v25 }
  0xa7   : > { %2118 = vmatpush1.msk.msra.mxu0 %vm306_vm2, %v590_v47  ;;  %667 = vmatprep.mubr.f32.mxu0 %v2333_v0 }
  0xa8   : > { %2121 = vmatprep.subr.msk.mxu0 %vm306_vm2, %v2442_v2  ;;  %v2120_v2 = vld [vmem:[%s2863_s2 + $0x10] sm:$0xf]  ;;  %v1079_v22 = vpop.permute.xlu1 %1078  ;;  %v1077_v23 = vpop.permute.xlu0 %1076 }
  0xa9   : > { %v1082_v27 = vsel %vm1080_vm9, %v1079_v22, %v1077_v23  ;;  %v1081_v9 = vsel %vm1080_vm9, %v1077_v23, %v1079_v22 }
  0xaa   : > { %v1097_v31 = vmul.f32 %v2644_v26, %v1082_v27  ;;  %v1096_v33 = vmul.f32 %v2656_v32, %v1081_v9 }
  0xae   : > { %2119 = vmatmul.mubr.msk.f32.vlgmr.msra.gmra.mrb[0].mxu0 %vm302_vm4, %v2116_v54  ;;  %v2144_v54 = vld [vmem:[%s2865_s4 + $0x4] sm:$0xf] }
  0xaf   : > { %2122 = vmatpush1.msk.msra.mxu0 %vm306_vm2, %v2434_v1  ;;  %749 = vmatprep.mubr.f32.mxu0 %v2333_v0 }
  0xb0   : > { %2126 = vmatprep.subr.msk.mxu0 %vm306_vm2, %v779_v55 }
  0xb6   : > { %2123 = vmatmul.mubr.msk.f32.vlgmr.msra.gmra.mrb[0].mxu0 %vm302_vm4, %v2120_v2 }
  0xb7   : > { %2127 = vmatpush1.msk.msra.mxu0 %vm306_vm2, %v778_v63  ;;  %855 = vmatprep.mubr.f32.mxu0 %v2333_v0 }
  0xb8   : > { %2131 = vmatprep.subr.msk.mxu0 %vm306_vm2, %v885_v3 }
  0xb9   : > { %v1186_v35 = vpop.permute.xlu0 %1185 }
  0xbe   : > { %2128 = vmatmul.mubr.msk.f32.vlgmr.msra.gmra.mrb[0].mxu0 %vm302_vm4, %v2125_v19  ;;  %v2155_v19 = vld [vmem:[%s2865_s4 + $0xc] sm:$0xf] }
  0xbf   : > { %2132 = vmatpush1.msk.msra.mxu0 %vm306_vm2, %v884_v18  ;;  %961 = vmatprep.mubr.f32.mxu0 %v2333_v0 }
  0xc0   : > { %2136 = vmatprep.subr.msk.mxu0 %vm306_vm2, %v991_v20 }
  0xc6   : > { %2133 = vmatmul.mubr.msk.f32.vlgmr.msra.gmra.mrb[0].mxu0 %vm302_vm4, %v2130_v30 }
  0xc7   : > { %2137 = vmatpush1.msk.msra.mxu0 %vm306_vm2, %v990_v29  ;;  %1067 = vmatprep.mubr.f32.mxu0 %v2333_v0 }
  0xc8   : > { %2141 = vmatprep.subr.msk.mxu0 %vm306_vm2, %v1097_v31 }
  0xce   : > { %2138 = vmatmul.mubr.msk.f32.vlgmr.msra.gmra.mrb[0].mxu0 %vm302_vm4, %v2135_v34 }
  0xcf   : > { %2142 = vmatpush1.msk.msra.mxu0 %vm306_vm2, %v1096_v33  ;;  %1173 = vmatprep.mubr.f32.mxu0 %v2333_v0 }
  0xd6   : > { %2143 = vmatmul.mubr.msk.f32.vlgmr.msra.gmra.mrb[0].mxu0 %vm302_vm4, %v2140_v8 }
 0x1a9   : > { %v1175_v37 = vpop.f32.mrb[0].mxu0 }
 0x1aa   : > { %v1188_v38 = vadd.f32 %v1186_v35, %v1175_v37  ;;  %v1177_v40 = vpop.f32.mrb[1].mxu0 }
 0x1ab   : > { %v1189_v42 = vadd.f32 %v1186_v35, %v1177_v40 }
 0x1ac   : > { %v2673_v41 = vmax.f32 %v1188_v38, 0.0 }
 0x1ad   : > { %v1191_v43 = vmax.f32 %v1189_v42, 0.0 }
 0x1ae   : > { %1192 = vrot.lane.b32.xlu0 %v2673_v41, %s2334_s14  ;;  %1201 = vrot.lane.b32.xlu1 %v2673_v41, %s2335_s15 }
 0x1b2   : > { %1371 = vrot.lane.b32.xlu0 %v2673_v41, %s2336_s16  ;;  %1203 = vrot.lane.b32.xlu1 %v1191_v43, %s2335_s15 }
 0x1b6   : > { %1463 = vrot.lane.b32.xlu0 %v2673_v41, %s2337_s17  ;;  %1194 = vrot.lane.b32.xlu1 %v1191_v43, %s2334_s14 }
 0x1ba   : > { %1639 = vrot.lane.b32.xlu0 %v2673_v41, %s2338_s18  ;;  %1373 = vrot.lane.b32.xlu1 %v1191_v43, %s2336_s16 }
 0x1be   : > { %1731 = vrot.lane.b32.xlu0 %v2673_v41, %s2339_s19  ;;  %1465 = vrot.lane.b32.xlu1 %v1191_v43, %s2337_s17 }
 0x1c2   : > { %1823 = vrot.lane.b32.xlu0 %v2673_v41, %s2340_s20  ;;  %1641 = vrot.lane.b32.xlu1 %v1191_v43, %s2338_s18 }
 0x1c6   : > { %1915 = vrot.lane.b32.xlu0 %v2673_v41, %s2341_s26  ;;  %1733 = vrot.lane.b32.xlu1 %v1191_v43, %s2339_s19  ;;  %s242_s19 = sand.u32 1, %s2323_s22  }
 0x1c7   : > { %s2022_s13 = scalar_lea.sflag [#allocation3], %s242_s19 }
 0x1ca   : > { %2010 = vperm.xlu0 %2267, %v2007_v44   ;;  %1825 = vrot.lane.b32.xlu1 %v1191_v43, %s2340_s20  ;;  %s2099_s20 = sshll.u32 %s242_s19, 3 }
 0x1cb   : > { %s244_s29 = scalar_lea.vmem [#allocation2], %s2099_s20 }
 0x1cc   : > { %s2036_s9 = sshll.u32 %s244_s29, 4  ;;  %s2821_s9 = int_to_ptr.vmem [resolvable:$true] %s2036_s9 }
 0x1cd   : > { %s2269_s28 = scalar_lea.vmem %s2821_s9, 128 }
 0x1ce   : > { %1917 = vrot.lane.b32.xlu1 %v1191_v43, %s2341_s26  ;;  %s2185_s26 = sshll.u32 %s2400_s25, 7  ;;  %p2270_p11 = scmp.ne.s32.totalorder %s2821_s9, %s2269_s28 }
 0x1cf   : > { %s2819_s12 = scalar_lea.hbm %s2867_s6, %s2185_s26  ;;  %s2343_s25 = smov [#allocation2]  }
 0x1d0   : > { %p2271_p12 = pnand %p2270_p11, %p2417_p5  ;;  %s2273_s14 = sshll.u32 %s2343_s25, 4  ;;  %s2274_s14 = int_to_ptr.vmem [resolvable:$false] %s2273_s14 }
 0x1d1   : > { %s2275_s15 = scalar_lea.vmem %s2274_s14, 256  ;;  %p2276_p0 = scmp.lt.s32.totalorder %s2821_s9, %s2274_s14 }
 0x1d2   : > { %p2272_p13 = pneg %p2271_p12  ;;  %p2277_p1 = scmp.lt.s32.totalorder %s2275_s15, %s2269_s28 }
 0x1d4   : > { %p2278_p2 = por %p2277_p1, %p2276_p0 }
 0x1d6   : > { %p2279_p3 = pnand %p2278_p2, %p2272_p13 }
 0x220   : > { %v1202_v46 = vpop.permute.xlu1 %1201  ;;  %v1193_v47 = vpop.permute.xlu0 %1192 }
 0x224   : > { %v1204_v48 = vpop.permute.xlu1 %1203  ;;  %v1372_v58 = vpop.permute.xlu0 %1371 }
 0x225   : > { %v1205_v49 = vsel %vm282_vm1, %v1202_v46, %v1204_v48  ;;  %v1206_v50 = vsel %vm282_vm1, %v1204_v48, %v1202_v46 }
 0x226   : > { %v1207_v51 = vmul.f32 %v1206_v50, %v2493_v15  ;;  %v1208_v53 = vmul.f32 %v1205_v49, %v2496_v16 }
 0x228   : > { %2145 = vmatprep.subr.msk.mxu1 %vm306_vm2, %v1208_v53  ;;  %v1195_v55 = vpop.permute.xlu1 %1194 }
 0x229   : > { %v1196_v56 = vsel %vm260_vm0, %v1193_v47, %v1195_v55  ;;  %v1197_v57 = vsel %vm260_vm0, %v1195_v55, %v1193_v47  ;;  %2146 = vmatpush1.msk.msra.mxu1 %vm306_vm2, %v1207_v51 }
 0x22a   : > { %v1198_v15 = vmul.f32 %v1197_v57, %v2499_v17  ;;  %v1199_v16 = vmul.f32 %v1196_v56, %v2489_v14  ;;  %2147 = vmatmul.mubr.msk.f32.vlgmr.msra.gmra.mrb[0].mxu1 %vm302_vm4, %v2144_v54  ;;  %v1200_v14 = vld [vmem:[%s2865_s4] sm:$0xf]  ;;  %v1464_v17 = vpop.permute.xlu0 %1463 }
 0x22b   : > { %1364 = vmatprep.mubr.f32.mxu1 %v2333_v0 }
 0x22c   : > { %2148 = vmatprep.subr.msk.mxu1 %vm306_vm2, %v1199_v16  ;;  %v1374_v60 = vpop.permute.xlu1 %1373 }
 0x22d   : > { %v1375_v62 = vsel %vm468_vm3, %v1372_v58, %v1374_v60  ;;  %2149 = vmatpush1.msk.msra.mxu1 %vm306_vm2, %v1198_v15  ;;  %v1376_v63 = vsel %vm468_vm3, %v1374_v60, %v1372_v58 }
 0x22e   : > { %v1378_v2 = vmul.f32 %v1375_v62, %v2517_v28  ;;  %v1377_v4 = vmul.f32 %v1376_v63, %v2536_v36  ;;  %v2151_v36 = vld [vmem:[%s2865_s4 + $0x8] sm:$0xf]  ;;  %v1640_v13 = vpop.permute.xlu0 %1639 }
 0x230   : > { %2152 = vmatprep.subr.msk.mxu1 %vm306_vm2, %v1378_v2  ;;  %v1466_v3 = vpop.permute.xlu1 %1465 }
 0x231   : > { %v1467_v5 = vsel %vm574_vm5, %v1464_v17, %v1466_v3  ;;  %v1468_v28 = vsel %vm574_vm5, %v1466_v3, %v1464_v17 }
 0x232   : > { %v1470_v6 = vmul.f32 %v1467_v5, %v2543_v39  ;;  %2150 = vmatmul.mubr.msk.f32.vlgmr.msra.gmra.mrb[0].mxu1 %vm302_vm4, %v1200_v14  ;;  %v1469_v11 = vmul.f32 %v1468_v28, %v2555_v45  ;;  %v1732_v21 = vpop.permute.xlu0 %1731 }
 0x233   : > { %2153 = vmatpush1.msk.msra.mxu1 %vm306_vm2, %v1377_v4  ;;  %1454 = vmatprep.mubr.f32.mxu1 %v2333_v0 }
 0x234   : > { %2156 = vmatprep.subr.msk.mxu1 %vm306_vm2, %v1470_v6  ;;  %v1642_v39 = vpop.permute.xlu1 %1641 }
 0x235   : > { %v1644_v18 = vsel %vm762_vm6, %v1642_v39, %v1640_v13  ;;  %v1643_v22 = vsel %vm762_vm6, %v1640_v13, %v1642_v39 }
 0x236   : > { %v1646_v20 = vmul.f32 %v1644_v18, %v2575_v52  ;;  %v2159_v52 = vld [vmem:[%s2865_s4 + $0x10] sm:$0xf]  ;;  %v1645_v25 = vmul.f32 %v1643_v22, %v2591_v59  ;;  %v1824_v30 = vpop.permute.xlu0 %1823  ;;  %v2163_v59 = vld [vmem:[%s2865_s4 + $0x14] sm:$0xf] }
 0x238   : > { %v1734_v45 = vpop.permute.xlu1 %1733 }
 0x239   : > { %v1736_v23 = vsel %vm868_vm7, %v1734_v45, %v1732_v21  ;;  %v1735_v31 = vsel %vm868_vm7, %v1732_v21, %v1734_v45 }
 0x23a   : > { %2154 = vmatmul.mubr.msk.f32.vlgmr.msra.gmra.mrb[0].mxu1 %vm302_vm4, %v2151_v36  ;;  %v1738_v27 = vmul.f32 %v1736_v23, %v2598_v61  ;;  %v1737_v61 = vmul.f32 %v1735_v31, %v2614_v10  ;;  %v1916_v8 = vpop.permute.xlu0 %1915  ;;  %v2167_v10 = vld [vmem:[%s2865_s4 + $0x18] sm:$0xf] }
 0x23b   : > { %2157 = vmatpush1.msk.msra.mxu1 %vm306_vm2, %v1469_v11  ;;  %1546 = vmatprep.mubr.f32.mxu1 %v2333_v0 }
 0x23c   : > { %2160 = vmatprep.subr.msk.mxu1 %vm306_vm2, %v1191_v43  ;;  %v1826_v29 = vpop.permute.xlu1 %1825 }
 0x23d   : > { %v1828_v9 = vsel %vm974_vm8, %v1826_v29, %v1824_v30  ;;  %v1827_v35 = vsel %vm974_vm8, %v1824_v30, %v1826_v29 }
 0x23e   : > { %v1830_v33 = vmul.f32 %v1828_v9, %v2621_v12  ;;  %v1829_v12 = vmul.f32 %v1827_v35, %v2637_v24 }
 0x240   : > { %v1918_v34 = vpop.permute.xlu1 %1917 }
 0x241   : > { %v1920_v37 = vsel %vm1080_vm9, %v1918_v34, %v1916_v8  ;;  %v1919_v40 = vsel %vm1080_vm9, %v1916_v8, %v1918_v34 }
 0x242   : > { %2158 = vmatmul.mubr.msk.f32.vlgmr.msra.gmra.mrb[0].mxu1 %vm302_vm4, %v2155_v19  ;;  %v1922_v38 = vmul.f32 %v1920_v37, %v2644_v26  ;;  %v1921_v24 = vmul.f32 %v1919_v40, %v2656_v32  ;;  %v2175_v26 = vld [vmem:[%s2865_s4 + $0x20] sm:$0xf] }
 0x243   : > { %2161 = vmatpush1.msk.msra.mxu1 %vm306_vm2, %v2673_v41  ;;  %1630 = vmatprep.mubr.f32.mxu1 %v2333_v0  ;;  %v2171_v41 = vld [vmem:[%s2865_s4 + $0x1c] sm:$0xf] }
 0x244   : > { %2164 = vmatprep.subr.msk.mxu1 %vm306_vm2, %v1646_v20 }
 0x249   : > { %v2011_v7 = vpop.permute.xlu0 %2010 }
 0x24a   : > { %2162 = vmatmul.mubr.msk.f32.vlgmr.msra.gmra.mrb[0].mxu1 %vm302_vm4, %v2159_v52 }
 0x24b   : > { %2165 = vmatpush1.msk.msra.mxu1 %vm306_vm2, %v1645_v25  ;;  %1722 = vmatprep.mubr.f32.mxu1 %v2333_v0 }
 0x24c   : > { %2168 = vmatprep.subr.msk.mxu1 %vm306_vm2, %v1738_v27 }
 0x252   : > { %2166 = vmatmul.mubr.msk.f32.vlgmr.msra.gmra.mrb[0].mxu1 %vm302_vm4, %v2163_v59 }
 0x253   : > { %2169 = vmatpush1.msk.msra.mxu1 %vm306_vm2, %v1737_v61  ;;  %1814 = vmatprep.mubr.f32.mxu1 %v2333_v0 }
 0x254   : > { %2172 = vmatprep.subr.msk.mxu1 %vm306_vm2, %v1830_v33 }
 0x25a   : > { %2170 = vmatmul.mubr.msk.f32.vlgmr.msra.gmra.mrb[0].mxu1 %vm302_vm4, %v2167_v10 }
 0x25b   : > { %2173 = vmatpush1.msk.msra.mxu1 %vm306_vm2, %v1829_v12  ;;  %1906 = vmatprep.mubr.f32.mxu1 %v2333_v0 }
 0x25c   : > { %2176 = vmatprep.subr.msk.mxu1 %vm306_vm2, %v1922_v38 }
 0x262   : > { %2174 = vmatmul.mubr.msk.f32.vlgmr.msra.gmra.mrb[0].mxu1 %vm302_vm4, %v2171_v41 }
 0x263   : > { %2177 = vmatpush1.msk.msra.mxu1 %vm306_vm2, %v1921_v24  ;;  %1998 = vmatprep.mubr.f32.mxu1 %v2333_v0 }
 0x26a   : > { %2178 = vmatmul.mubr.msk.f32.vlgmr.msra.gmra.mrb[0].mxu1 %vm302_vm4, %v2175_v26 }
 0x33d   : > { %v2000_v42 = vpop.f32.mrb[0].mxu1 }
 0x33e   : > { %v2013_v43 = vadd.f32 %v2011_v7, %v2000_v42  ;;  %v2002_v44 = vpop.f32.mrb[1].mxu1 }
 0x33f   : > { %v2014_v32 = vadd.f32 %v2011_v7, %v2002_v44 }
 0x341   : > { %v2017_v46 = vcombine.low %v2013_v43, %v2014_v32 }
 0x343   : > { %v2019_v0 = vadd.f32 %v2017_v46, %v2434_v1 }
 0x345   : > { %2020 = vst [vmem:[%s244_s29] sm:$0xff] %v2019_v0 }
 0x346   : > { %2282 = shalt.err (!%p2279_p3)
}
 0x347   : > { %s2283_s16 = scalar_lea.hbm %s2819_s12, 128  ;;  %s2287_s19 = scalar_lea.hbm %s2867_s6, 256 }
 0x348   : > { %p2284_p4 = scmp.ne.s32.totalorder %s2819_s12, %s2283_s16  ;;  %p2288_p9 = scmp.lt.u32.totalorder %s2819_s12, %s2867_s6 }
 0x349   : > { %p2289_p10 = scmp.lt.u32.totalorder %s2287_s19, %s2283_s16  ;;  %p2291_p12 = scmp.lt.u32.totalorder %s2283_s16, %s2819_s12 }
 0x34a   : > { %p2285_p7 = pnand %p2284_p4, %p2417_p5 }
 0x34b   : > { %p2290_p11 = por %p2289_p10, %p2288_p9 }
 0x34c   : > { %p2286_p8 = pneg %p2285_p7 }
 0x34d   : > { %p2292_p13 = por %p2291_p12, %p2290_p11 }
 0x34f   : > { %p2293_p0 = pnand %p2292_p13, %p2286_p8 }
 0x351   : > { %2296 = shalt.err (!%p2293_p0)
}
 0x352   : > { %2218 = dma.vmem_to_hbm [thread:$0]  (%p2417_p5), %s2821_s9, 128, %s2819_s12, %s2022_s13  }
 0x353 PF: > { %p2224_p1 = scmp.ge.s32.totalorder %s2331_s24, 2  ;;  %s2048_s29 = sand.u32 1, %s2319_s21  }
 0x354   : > { %s2049_s10 = scalar_lea.sflag [#allocation3], %s2048_s29 }
 0x355   : > { %p2221_p2 = pnand %p2224_p1, %p2421_p6 }
 0x357   : > { %2314 = dma.done.wait (!%p2221_p2), %s2049_s10, 128  }
 0x358   : > { %2316 = vsyncadd (!%p2221_p2), %s2049_s10, 4294967168  ;;  %p16_p3 = scmp.ge.s32.totalorder %s2404_s27, 4   ;;  %s2870_s21 = smov %s2323_s22 }
 0x359   : > { %s2871_s22 = smov %s2327_s23  ;;  %s2872_s23 = smov %s2415_s30 }
 0x35a   : > { %s2873_s24 = smov %s2404_s27  ;;  %18 = sbr.rel (!%p16_p3) target bundleno = 3 (0x3), region = 102 }
 0x361   :  { %2054 = vsyncpa [#allocation3], 1 }
 0x362   :  { %2056 = vsyncpa [#allocation3 + $0x1], 1 }

</bundles_post_ra>
